<compile_context>
chip_gen: v5e
topology: v5e:2x2
jax: 0.10.0
libtpu: 0.0.40
codegen_flags: <defaults>
</compile_context>

<pallas_src>
import functools

import jax
import jax.numpy as jnp
from jax.experimental import pallas as pl
from jax.experimental.pallas import tpu as pltpu

LANE = 128
IN_FEATURES = 784
HIDDEN = 100
OUT_FEATURES = 10


def _softplus_stable(x):
    # softplus(x) = max(x, 0) + log1p(exp(-|x|))
    # Equals F.softplus(x, beta=1, threshold=100) for all non-pathological inputs
    # (returns x exactly for large x, since exp(-|x|) underflows to 0) and avoids
    # the f32 exp overflow of the naive threshold formulation.
    return jnp.maximum(x, 0.0) + jnp.log1p(jnp.exp(-jnp.abs(x)))


def _n_hidden(num_layers):
    # fc1, fc2 always; fc3 if layers >= 4; fc4 if layers == 5.
    return 2 + (1 if num_layers >= 4 else 0) + (1 if num_layers == 5 else 0)


def _fcn_kernel(n_hidden, x_ref, *refs):
    """One batch tile: x_ref (TB, 784) bf16 -> out_ref (TB, 128) f32 (cols >=10 are 0)."""
    out_ref = refs[-1]
    params = refs[:-1]  # [w0, b0, w1, b1, ..., w_final, b_final]

    h = x_ref[...]  # bf16, (TB, 784)
    for layer in range(n_hidden):
        w = params[2 * layer][...]          # bf16, (K, 128)
        b = params[2 * layer + 1][...]      # f32,  (1, 128)
        z = jnp.dot(h, w, preferred_element_type=jnp.float32) + b   # f32 accumulate
        h = _softplus_stable(z).astype(jnp.bfloat16)                # activation in f32

    wf = params[2 * n_hidden][...]
    bf = params[2 * n_hidden + 1][...]
    out = jnp.dot(h, wf, preferred_element_type=jnp.float32) + bf
    out_ref[...] = out.astype(out_ref.dtype)


def init_fcn_params(key, num_layers):
    """Torch-like nn.Linear init (uniform +-1/sqrt(fan_in)), stored TPU-friendly:

    Weights are (in_features[_padded], 128) bf16 with zero-padded rows/cols so the
    kernel computes x @ W + b; biases are (1, 128) f32 with zero padding.
    Zero-padded *rows* guarantee the junk in padded activation lanes never leaks
    into real outputs.
    """
    n_hidden = _n_hidden(num_layers)
    dims = ([(IN_FEATURES, HIDDEN)]
            + [(HIDDEN, HIDDEN)] * (n_hidden - 1)
            + [(HIDDEN, OUT_FEATURES)])

    params = []
    for li, (fan_in, fan_out) in enumerate(dims):
        key, kw, kb = jax.random.split(key, 3)
        bound = 1.0 / (fan_in ** 0.5)
        w = jax.random.uniform(kw, (fan_in, fan_out), jnp.float32, -bound, bound)
        b = jax.random.uniform(kb, (fan_out,), jnp.float32, -bound, bound)
        in_pad = IN_FEATURES if li == 0 else LANE
        w_p = jnp.zeros((in_pad, LANE), jnp.float32).at[:fan_in, :fan_out].set(w)
        b_p = jnp.zeros((1, LANE), jnp.float32).at[0, :fan_out].set(b)
        params.append(w_p.astype(jnp.bfloat16))
        params.append(b_p)
    return params


def _round_up(n, m):
    return ((n + m - 1) // m) * m


@functools.partial(jax.jit, static_argnames=("num_layers",))
def fcn_forward(x_nchw, params, num_layers):
    # torch.flatten(x, 1); cast to bf16 to halve the dominant HBM stream.
    B = x_nchw.shape[0]
    x = x_nchw.reshape(B, -1).astype(jnp.bfloat16)          # (B, 784)
    assert x.shape[1] == IN_FEATURES, "FCN expects 784 input features after flatten"

    # Batch tile: >=512 rows when possible (amortizes ~0.35us/step), capped so the
    # double-buffered x tile + resident params stay well inside v7x's 64 MiB VMEM.
    TB = min(512, _round_up(B, 8))
    Bp = _round_up(B, TB)
    if Bp != B:
        x = jnp.pad(x, ((0, Bp - B), (0, 0)))

    n_hidden = _n_hidden(num_layers)
    kernel = functools.partial(_fcn_kernel, n_hidden)

    # Weights/biases: full-shape blocks, constant index_map -> DMA'd once, VMEM-resident.
    param_specs = [pl.BlockSpec(p.shape, lambda i: (0, 0)) for p in params]

    out_padded = pl.pallas_call(
        kernel,
        out_shape=jax.ShapeDtypeStruct((Bp, LANE), jnp.float32),
        grid=(Bp // TB,),
        in_specs=[pl.BlockSpec((TB, IN_FEATURES), lambda i: (i, 0))] + param_specs,
        out_specs=pl.BlockSpec((TB, LANE), lambda i: (i, 0)),
        compiler_params=pltpu.CompilerParams(
            dimension_semantics=("parallel",),          # megacore batch sharding (v7x)
            vmem_limit_bytes=32 * 1024 * 1024,
        ),
    )(x, *params)

    return out_padded[:B, :OUT_FEATURES]


def fcn_reference(x_nchw, params, num_layers):
    """Pure-JAX reference using the same padded bf16 params / f32 accumulation."""
    B = x_nchw.shape[0]
    h = x_nchw.reshape(B, -1).astype(jnp.bfloat16)
    n_hidden = _n_hidden(num_layers)
    for layer in range(n_hidden):
        w, b = params[2 * layer], params[2 * layer + 1]
        z = jnp.dot(h, w, preferred_element_type=jnp.float32) + b
        h = _softplus_stable(z).astype(jnp.bfloat16)
    wf, bf = params[2 * n_hidden], params[2 * n_hidden + 1]
    out = jnp.dot(h, wf, preferred_element_type=jnp.float32) + bf
    return out[:, :OUT_FEATURES]


if __name__ == "__main__":
    num_layers = 5  # exercises fc1, fc2, fc3, fc4, fc_final
    key = jax.random.PRNGKey(0)
    kx, kp = jax.random.split(key)

    # Small batch, MNIST-like spatial shape so flatten -> 784 (matches fc1).
    x = jax.random.normal(kx, (4, 1, 28, 28), dtype=jnp.float32)
    params = init_fcn_params(kp, num_layers)

    out = fcn_forward(x, params, num_layers)
    out = jax.block_until_ready(out)
    assert out.shape == (4, 10)

    ref = fcn_reference(x, params, num_layers)
    assert jnp.allclose(out, ref, atol=2e-3, rtol=2e-3), "mismatch vs reference"

    print("KERNEL_OK")
</pallas_src>

<mosaic_0001>
module attributes {stable_mosaic.version = 11 : i64} {
  func.func @_fcn_kernel(%arg0: i32, %arg1: memref<8x784xbf16, #tpu.memory_space<vmem>>, %arg2: memref<784x128xbf16, #tpu.memory_space<vmem>>, %arg3: memref<1x128xf32, #tpu.memory_space<vmem>>, %arg4: memref<128x128xbf16, #tpu.memory_space<vmem>>, %arg5: memref<1x128xf32, #tpu.memory_space<vmem>>, %arg6: memref<128x128xbf16, #tpu.memory_space<vmem>>, %arg7: memref<1x128xf32, #tpu.memory_space<vmem>>, %arg8: memref<128x128xbf16, #tpu.memory_space<vmem>>, %arg9: memref<1x128xf32, #tpu.memory_space<vmem>>, %arg10: memref<128x128xbf16, #tpu.memory_space<vmem>>, %arg11: memref<1x128xf32, #tpu.memory_space<vmem>>, %arg12: memref<8x128xf32, #tpu.memory_space<vmem>>) attributes {dimension_semantics = [#tpu.dimension_semantics<parallel>], iteration_bounds = array<i64: 1>, scalar_prefetch = 0 : i64, scratch_operands = 0 : i64, tpu.core_type = #tpu.core_type<tc>, window_params = [{transform_indices = @transform_0, window_bounds = array<i64: 8, 784>}, {pipeline_mode = #tpu.pipeline_mode<synchronous>, transform_indices = @transform_1, window_bounds = array<i64: 784, 128>}, {pipeline_mode = #tpu.pipeline_mode<synchronous>, transform_indices = @transform_2, window_bounds = array<i64: 1, 128>}, {pipeline_mode = #tpu.pipeline_mode<synchronous>, transform_indices = @transform_3, window_bounds = array<i64: 128, 128>}, {pipeline_mode = #tpu.pipeline_mode<synchronous>, transform_indices = @transform_4, window_bounds = array<i64: 1, 128>}, {pipeline_mode = #tpu.pipeline_mode<synchronous>, transform_indices = @transform_5, window_bounds = array<i64: 128, 128>}, {pipeline_mode = #tpu.pipeline_mode<synchronous>, transform_indices = @transform_6, window_bounds = array<i64: 1, 128>}, {pipeline_mode = #tpu.pipeline_mode<synchronous>, transform_indices = @transform_7, window_bounds = array<i64: 128, 128>}, {pipeline_mode = #tpu.pipeline_mode<synchronous>, transform_indices = @transform_8, window_bounds = array<i64: 1, 128>}, {pipeline_mode = #tpu.pipeline_mode<synchronous>, transform_indices = @transform_9, window_bounds = array<i64: 128, 128>}, {pipeline_mode = #tpu.pipeline_mode<synchronous>, transform_indices = @transform_10, window_bounds = array<i64: 1, 128>}, {transform_indices = @transform_11, window_bounds = array<i64: 8, 128>}]} {
    %c0 = arith.constant 0 : index
    %c0_0 = arith.constant 0 : index
    %0 = vector.load %arg1[%c0, %c0_0] : memref<8x784xbf16, #tpu.memory_space<vmem>>, vector<8x784xbf16>
    %c0_1 = arith.constant 0 : index
    %c0_2 = arith.constant 0 : index
    %1 = vector.load %arg2[%c0_1, %c0_2] : memref<784x128xbf16, #tpu.memory_space<vmem>>, vector<784x128xbf16>
    %c0_3 = arith.constant 0 : index
    %c0_4 = arith.constant 0 : index
    %2 = vector.load %arg3[%c0_3, %c0_4] : memref<1x128xf32, #tpu.memory_space<vmem>>, vector<1x128xf32>
    %cst = arith.constant dense<0.000000e+00> : vector<8x128xf32>
    %3 = tpu.matmul %0, %1, %cst {dimension_numbers = #tpu.dot_dimension_numbers<[1], [0], [0], [1], [0, 0, 1, 1], [], []>} : vector<8x784xbf16>, vector<784x128xbf16>, vector<8x128xf32> -> vector<8x128xf32>
    %4 = vector.broadcast %2 : vector<1x128xf32> to vector<8x128xf32>
    %5 = arith.addf %3, %4 : vector<8x128xf32>
    %cst_5 = arith.constant 0.000000e+00 : f32
    %6 = vector.broadcast %cst_5 : f32 to vector<8x128xf32>
    %7 = arith.maximumf %5, %6 : vector<8x128xf32>
    %8 = math.absf %5 : vector<8x128xf32>
    %cst_6 = arith.constant 0.000000e+00 : f32
    %9 = vector.broadcast %cst_6 : f32 to vector<8x128xf32>
    %10 = arith.subf %9, %8 : vector<8x128xf32>
    %11 = math.exp %10 : vector<8x128xf32>
    %12 = math.log1p %11 : vector<8x128xf32>
    %13 = arith.addf %7, %12 : vector<8x128xf32>
    %14 = arith.truncf %13 : vector<8x128xf32> to vector<8x128xbf16>
    %c0_7 = arith.constant 0 : index
    %c0_8 = arith.constant 0 : index
    %15 = vector.load %arg4[%c0_7, %c0_8] : memref<128x128xbf16, #tpu.memory_space<vmem>>, vector<128x128xbf16>
    %c0_9 = arith.constant 0 : index
    %c0_10 = arith.constant 0 : index
    %16 = vector.load %arg5[%c0_9, %c0_10] : memref<1x128xf32, #tpu.memory_space<vmem>>, vector<1x128xf32>
    %cst_11 = arith.constant dense<0.000000e+00> : vector<8x128xf32>
    %17 = tpu.matmul %14, %15, %cst_11 {dimension_numbers = #tpu.dot_dimension_numbers<[1], [0], [0], [1], [0, 0, 1, 1], [], []>} : vector<8x128xbf16>, vector<128x128xbf16>, vector<8x128xf32> -> vector<8x128xf32>
    %18 = vector.broadcast %16 : vector<1x128xf32> to vector<8x128xf32>
    %19 = arith.addf %17, %18 : vector<8x128xf32>
    %cst_12 = arith.constant 0.000000e+00 : f32
    %20 = vector.broadcast %cst_12 : f32 to vector<8x128xf32>
    %21 = arith.maximumf %19, %20 : vector<8x128xf32>
    %22 = math.absf %19 : vector<8x128xf32>
    %cst_13 = arith.constant 0.000000e+00 : f32
    %23 = vector.broadcast %cst_13 : f32 to vector<8x128xf32>
    %24 = arith.subf %23, %22 : vector<8x128xf32>
    %25 = math.exp %24 : vector<8x128xf32>
    %26 = math.log1p %25 : vector<8x128xf32>
    %27 = arith.addf %21, %26 : vector<8x128xf32>
    %28 = arith.truncf %27 : vector<8x128xf32> to vector<8x128xbf16>
    %c0_14 = arith.constant 0 : index
    %c0_15 = arith.constant 0 : index
    %29 = vector.load %arg6[%c0_14, %c0_15] : memref<128x128xbf16, #tpu.memory_space<vmem>>, vector<128x128xbf16>
    %c0_16 = arith.constant 0 : index
    %c0_17 = arith.constant 0 : index
    %30 = vector.load %arg7[%c0_16, %c0_17] : memref<1x128xf32, #tpu.memory_space<vmem>>, vector<1x128xf32>
    %cst_18 = arith.constant dense<0.000000e+00> : vector<8x128xf32>
    %31 = tpu.matmul %28, %29, %cst_18 {dimension_numbers = #tpu.dot_dimension_numbers<[1], [0], [0], [1], [0, 0, 1, 1], [], []>} : vector<8x128xbf16>, vector<128x128xbf16>, vector<8x128xf32> -> vector<8x128xf32>
    %32 = vector.broadcast %30 : vector<1x128xf32> to vector<8x128xf32>
    %33 = arith.addf %31, %32 : vector<8x128xf32>
    %cst_19 = arith.constant 0.000000e+00 : f32
    %34 = vector.broadcast %cst_19 : f32 to vector<8x128xf32>
    %35 = arith.maximumf %33, %34 : vector<8x128xf32>
    %36 = math.absf %33 : vector<8x128xf32>
    %cst_20 = arith.constant 0.000000e+00 : f32
    %37 = vector.broadcast %cst_20 : f32 to vector<8x128xf32>
    %38 = arith.subf %37, %36 : vector<8x128xf32>
    %39 = math.exp %38 : vector<8x128xf32>
    %40 = math.log1p %39 : vector<8x128xf32>
    %41 = arith.addf %35, %40 : vector<8x128xf32>
    %42 = arith.truncf %41 : vector<8x128xf32> to vector<8x128xbf16>
    %c0_21 = arith.constant 0 : index
    %c0_22 = arith.constant 0 : index
    %43 = vector.load %arg8[%c0_21, %c0_22] : memref<128x128xbf16, #tpu.memory_space<vmem>>, vector<128x128xbf16>
    %c0_23 = arith.constant 0 : index
    %c0_24 = arith.constant 0 : index
    %44 = vector.load %arg9[%c0_23, %c0_24] : memref<1x128xf32, #tpu.memory_space<vmem>>, vector<1x128xf32>
    %cst_25 = arith.constant dense<0.000000e+00> : vector<8x128xf32>
    %45 = tpu.matmul %42, %43, %cst_25 {dimension_numbers = #tpu.dot_dimension_numbers<[1], [0], [0], [1], [0, 0, 1, 1], [], []>} : vector<8x128xbf16>, vector<128x128xbf16>, vector<8x128xf32> -> vector<8x128xf32>
    %46 = vector.broadcast %44 : vector<1x128xf32> to vector<8x128xf32>
    %47 = arith.addf %45, %46 : vector<8x128xf32>
    %cst_26 = arith.constant 0.000000e+00 : f32
    %48 = vector.broadcast %cst_26 : f32 to vector<8x128xf32>
    %49 = arith.maximumf %47, %48 : vector<8x128xf32>
    %50 = math.absf %47 : vector<8x128xf32>
    %cst_27 = arith.constant 0.000000e+00 : f32
    %51 = vector.broadcast %cst_27 : f32 to vector<8x128xf32>
    %52 = arith.subf %51, %50 : vector<8x128xf32>
    %53 = math.exp %52 : vector<8x128xf32>
    %54 = math.log1p %53 : vector<8x128xf32>
    %55 = arith.addf %49, %54 : vector<8x128xf32>
    %56 = arith.truncf %55 : vector<8x128xf32> to vector<8x128xbf16>
    %c0_28 = arith.constant 0 : index
    %c0_29 = arith.constant 0 : index
    %57 = vector.load %arg10[%c0_28, %c0_29] : memref<128x128xbf16, #tpu.memory_space<vmem>>, vector<128x128xbf16>
    %c0_30 = arith.constant 0 : index
    %c0_31 = arith.constant 0 : index
    %58 = vector.load %arg11[%c0_30, %c0_31] : memref<1x128xf32, #tpu.memory_space<vmem>>, vector<1x128xf32>
    %cst_32 = arith.constant dense<0.000000e+00> : vector<8x128xf32>
    %59 = tpu.matmul %56, %57, %cst_32 {dimension_numbers = #tpu.dot_dimension_numbers<[1], [0], [0], [1], [0, 0, 1, 1], [], []>} : vector<8x128xbf16>, vector<128x128xbf16>, vector<8x128xf32> -> vector<8x128xf32>
    %60 = vector.broadcast %58 : vector<1x128xf32> to vector<8x128xf32>
    %61 = arith.addf %59, %60 : vector<8x128xf32>
    %c0_33 = arith.constant 0 : index
    %c0_34 = arith.constant 0 : index
    %62 = vector.load %arg12[%c0_33, %c0_34] : memref<8x128xf32, #tpu.memory_space<vmem>>, vector<8x128xf32>
    tpu.vector_store %arg12[%c0_33, %c0_34], %61 {strides = array<i32>} : memref<8x128xf32, #tpu.memory_space<vmem>>, vector<8x128xf32>,
    return
  }
  func.func @transform_0(%arg0: i32) -> (i32, i32) {
    %c0_i32 = arith.constant 0 : i32
    %c0_i32_0 = arith.constant 0 : i32
    return %arg0, %c0_i32 : i32, i32
  }
  func.func @transform_1(%arg0: i32) -> (i32, i32) {
    %c0_i32 = arith.constant 0 : i32
    %c0_i32_0 = arith.constant 0 : i32
    %c0_i32_1 = arith.constant 0 : i32
    return %c0_i32, %c0_i32_0 : i32, i32
  }
  func.func @transform_2(%arg0: i32) -> (i32, i32) {
    %c0_i32 = arith.constant 0 : i32
    %c0_i32_0 = arith.constant 0 : i32
    %c0_i32_1 = arith.constant 0 : i32
    return %c0_i32, %c0_i32_0 : i32, i32
  }
  func.func @transform_3(%arg0: i32) -> (i32, i32) {
    %c0_i32 = arith.constant 0 : i32
    %c0_i32_0 = arith.constant 0 : i32
    %c0_i32_1 = arith.constant 0 : i32
    return %c0_i32, %c0_i32_0 : i32, i32
  }
  func.func @transform_4(%arg0: i32) -> (i32, i32) {
    %c0_i32 = arith.constant 0 : i32
    %c0_i32_0 = arith.constant 0 : i32
    %c0_i32_1 = arith.constant 0 : i32
    return %c0_i32, %c0_i32_0 : i32, i32
  }
  func.func @transform_5(%arg0: i32) -> (i32, i32) {
    %c0_i32 = arith.constant 0 : i32
    %c0_i32_0 = arith.constant 0 : i32
    %c0_i32_1 = arith.constant 0 : i32
    return %c0_i32, %c0_i32_0 : i32, i32
  }
  func.func @transform_6(%arg0: i32) -> (i32, i32) {
    %c0_i32 = arith.constant 0 : i32
    %c0_i32_0 = arith.constant 0 : i32
    %c0_i32_1 = arith.constant 0 : i32
    return %c0_i32, %c0_i32_0 : i32, i32
  }
  func.func @transform_7(%arg0: i32) -> (i32, i32) {
    %c0_i32 = arith.constant 0 : i32
    %c0_i32_0 = arith.constant 0 : i32
    %c0_i32_1 = arith.constant 0 : i32
    return %c0_i32, %c0_i32_0 : i32, i32
  }
  func.func @transform_8(%arg0: i32) -> (i32, i32) {
    %c0_i32 = arith.constant 0 : i32
    %c0_i32_0 = arith.constant 0 : i32
    %c0_i32_1 = arith.constant 0 : i32
    return %c0_i32, %c0_i32_0 : i32, i32
  }
  func.func @transform_9(%arg0: i32) -> (i32, i32) {
    %c0_i32 = arith.constant 0 : i32
    %c0_i32_0 = arith.constant 0 : i32
    %c0_i32_1 = arith.constant 0 : i32
    return %c0_i32, %c0_i32_0 : i32, i32
  }
  func.func @transform_10(%arg0: i32) -> (i32, i32) {
    %c0_i32 = arith.constant 0 : i32
    %c0_i32_0 = arith.constant 0 : i32
    %c0_i32_1 = arith.constant 0 : i32
    return %c0_i32, %c0_i32_0 : i32, i32
  }
  func.func @transform_11(%arg0: i32) -> (i32, i32) {
    %c0_i32 = arith.constant 0 : i32
    %c0_i32_0 = arith.constant 0 : i32
    return %arg0, %c0_i32 : i32, i32
  }
}

</mosaic_0001>

<bundles_post_ra>
// kernel: fcn_forward.1
= control target key start
LH: loop header
LB: loop body
LE: loop exit
PB: predicated region body
PF: predicated region fallthrough
CT: control target
= control target key end

     0   :  { %16 = vsyncpa [#allocation3], 0  ;;  %s1424_s20 = smov [#allocation2]   ;;  %s1425_s22 = smov 64   ;;  %s1616_s0 = inlined_call_operand.vmem [shape: bf16[8,784], index: 0, kind: input, shape index: {}]   ;;  %s1617_s1 = inlined_call_operand.hbm [shape: bf16[784,128], index: 1, kind: input, shape index: {}]   ;;  %s1618_s2 = inlined_call_operand.vmem [shape: f32[1,128], index: 2, kind: input, shape index: {}]   ;;  %s1619_s3 = inlined_call_operand.vmem [shape: bf16[128,128], index: 3, kind: input, shape index: {}]   ;;  %s1620_s4 = inlined_call_operand.vmem [shape: f32[1,128], index: 4, kind: input, shape index: {}]   ;;  %s1621_s5 = inlined_call_operand.vmem [shape: bf16[128,128], index: 5, kind: input, shape index: {}]   ;;  %s1622_s6 = inlined_call_operand.vmem [shape: f32[1,128], index: 6, kind: input, shape index: {}]   ;;  %s1623_s7 = inlined_call_operand.vmem [shape: bf16[128,128], index: 7, kind: input, shape index: {}]   ;;  %s1624_s8 = inlined_call_operand.vmem [shape: f32[1,128], index: 8, kind: input, shape index: {}]   ;;  %s1625_s9 = inlined_call_operand.vmem [shape: bf16[128,128], index: 9, kind: input, shape index: {}]   ;;  %s1626_s10 = inlined_call_operand.vmem [shape: f32[1,128], index: 10, kind: input, shape index: {}]   ;;  %s1627_s11 = inlined_call_operand.vmem [shape: f32[8,128], index: 11, kind: output, shape index: {}]  }
   0x1   :  { %s23_s19 = sshll.u32 %s1617_s1, 4  ;;  %s25_s21 = sshll.u32 %s1424_s20, 4  ;;  %s24_s19 = int_to_ptr.hbm [resolvable:$true] %s23_s19  ;;  %s26_s21 = int_to_ptr.vmem [resolvable:$true] %s25_s21 }
   0x2   :  { %s1426_s23 = smov 4  }
   0x3   :  { %31 = dma.hbm_to_vmem [thread:$0]  %s24_s19, 6272, %s26_s21, [#allocation3], %s1425_s22, %s1425_s22, %s1426_s23  }
   0x4   :  { %1422 = dma.done.wait [#allocation3], 6272  }
   0x5   :  { %1423 = vsyncadd [#allocation3], 4294961024  ;;  %v1300_v0 = vld [vmem:[#allocation2 + $0x38] sm:$0xff]  ;;  %v1299_v3 = vld [vmem:[#allocation2 + $0x30] sm:$0xff]  ;;  %vm479_vm0 = vcmask 130048  }
   0x6   :  { %v1308_v1 = vld [vmem:[#allocation2 + $0x78] sm:$0xff]  ;;  %483 = vmatpush.bf16.msra.mxu0 %v1300_v0  ;;  %v1307_v4 = vld [vmem:[#allocation2 + $0x70] sm:$0xff]  ;;  %v1298_v8 = vld [vmem:[#allocation2 + $0x28] sm:$0xff] }
   0x7   :  { %v1316_v2 = vld [vmem:[#allocation2 + $0xb8] sm:$0xff]  ;;  %496 = vmatpush.bf16.msra.mxu1 %v1308_v1  ;;  %v1315_v5 = vld [vmem:[#allocation2 + $0xb0] sm:$0xff]  ;;  %v1306_v9 = vld [vmem:[#allocation2 + $0x68] sm:$0xff] }
   0x8   :  { %509 = vmatpush.bf16.msra.mxu2 %v1316_v2  ;;  %v1324_v6 = vld [vmem:[#allocation2 + $0xf8] sm:$0xff]  ;;  %v1323_v7 = vld [vmem:[#allocation2 + $0xf0] sm:$0xff]  ;;  %v1314_v10 = vld [vmem:[#allocation2 + $0xa8] sm:$0xff] }
   0x9   :  { %522 = vmatpush.bf16.msra.mxu3 %v1324_v6  ;;  %v1322_v11 = vld [vmem:[#allocation2 + $0xe8] sm:$0xff]  ;;  %v1297_v12 = vld [vmem:[#allocation2 + $0x20] sm:$0xff]  ;;  %v1296_v16 = vld [vmem:[#allocation2 + $0x18] sm:$0xff] }
   0xa   :  { %484 = vmatpush.bf16.msra.mxu0 %v1299_v3  ;;  %v1305_v13 = vld [vmem:[#allocation2 + $0x60] sm:$0xff]  ;;  %v1304_v17 = vld [vmem:[#allocation2 + $0x58] sm:$0xff]  ;;  %v1295_v20 = vld [vmem:[#allocation2 + $0x10] sm:$0xff] }
   0xb   :  { %497 = vmatpush.bf16.msra.mxu1 %v1307_v4  ;;  %v1313_v14 = vld [vmem:[#allocation2 + $0xa0] sm:$0xff]  ;;  %v1312_v18 = vld [vmem:[#allocation2 + $0x98] sm:$0xff]  ;;  %v1303_v21 = vld [vmem:[#allocation2 + $0x50] sm:$0xff] }
   0xc   :  { %510 = vmatpush.bf16.msra.mxu2 %v1315_v5  ;;  %v1321_v15 = vld [vmem:[#allocation2 + $0xe0] sm:$0xff]  ;;  %v1320_v19 = vld [vmem:[#allocation2 + $0xd8] sm:$0xff]  ;;  %v1311_v22 = vld [vmem:[#allocation2 + $0x90] sm:$0xff] }
   0xd   :  { %523 = vmatpush.bf16.msra.mxu3 %v1323_v7  ;;  %v1319_v23 = vld [vmem:[#allocation2 + $0xd0] sm:$0xff]  ;;  %v1294_v24 = vld [vmem:[#allocation2 + $0x8] sm:$0xff]  ;;  %v55_v26 = vld [vmem:[%s1616_s0] sm:$0xff] }
   0xe   :  { %485 = vmatpush.bf16.msra.mxu0 %v1298_v8  ;;  %v1302_v25 = vld [vmem:[#allocation2 + $0x48] sm:$0xff]  ;;  %v165_v29 = vunpack.c.l.b16 %v55_v26  ;;  %v166_v31 = vunpack.c.h.b16 %v55_v26  ;;  %v1293_v32 = vld [vmem:[#allocation2] sm:$0xff]  ;;  %v1332_v34 = vld [vmem:[#allocation2 + $0x138] sm:$0xff] }
   0xf   :  { %498 = vmatpush.bf16.msra.mxu1 %v1306_v9  ;;  %v1310_v27 = vld [vmem:[#allocation2 + $0x88] sm:$0xff]  ;;  %v1301_v33 = vld [vmem:[#allocation2 + $0x40] sm:$0xff]  ;;  %v1340_v35 = vld [vmem:[#allocation2 + $0x178] sm:$0xff] }
  0x10   :  { %511 = vmatpush.bf16.msra.mxu2 %v1314_v10  ;;  %v56_v28 = vld [vmem:[%s1616_s0 + $0x8] sm:$0xff]  ;;  %v1309_v36 = vld [vmem:[#allocation2 + $0x80] sm:$0xff]  ;;  %v172_v38 = vpack.c.b16 %v165_v29, %v165_v29  ;;  %v173_v39 = vpack.c.b16 %v166_v31, %v166_v31  ;;  %v1331_v43 = vld [vmem:[#allocation2 + $0x130] sm:$0xff] }
  0x11   :  { %524 = vmatpush.bf16.msra.mxu3 %v1322_v11  ;;  %v1318_v30 = vld [vmem:[#allocation2 + $0xc8] sm:$0xff]  ;;  %v167_v37 = vunpack.c.l.b16 %v56_v28  ;;  %v168_v40 = vunpack.c.h.b16 %v56_v28  ;;  %v1317_v41 = vld [vmem:[#allocation2 + $0xc0] sm:$0xff]  ;;  %v1339_v44 = vld [vmem:[#allocation2 + $0x170] sm:$0xff] }
  0x12   :  { %486 = vmatpush.bf16.msra.mxu0 %v1297_v12  ;;  %v1341_v42 = vld [vmem:[#allocation2 + $0x180] sm:$0xff]  ;;  %v1330_v47 = vld [vmem:[#allocation2 + $0x128] sm:$0xff]  ;;  %v58_v51 = vld [vmem:[%s1616_s0 + $0x18] sm:$0xf] }
  0x13   :  { %499 = vmatpush.bf16.msra.mxu1 %v1305_v13  ;;  %v174_v45 = vpack.c.b16 %v167_v37, %v167_v37  ;;  %v175_v46 = vpack.c.b16 %v168_v40, %v168_v40  ;;  %v1338_v48 = vld [vmem:[#allocation2 + $0x168] sm:$0xff]  ;;  %v1329_v49 = vld [vmem:[#allocation2 + $0x120] sm:$0xff]  ;;  %v1328_v52 = vld [vmem:[#allocation2 + $0x118] sm:$0xff]  ;;  %v171_v54 = vunpack.c.l.b16 %v58_v51 }
  0x14   :  { %512 = vmatpush.bf16.msra.mxu2 %v1313_v14  ;;  %v1337_v50 = vld [vmem:[#allocation2 + $0x160] sm:$0xff]  ;;  %v1336_v53 = vld [vmem:[#allocation2 + $0x158] sm:$0xff]  ;;  %v1327_v55 = vld [vmem:[#allocation2 + $0x110] sm:$0xff] }
  0x15   :  { %525 = vmatpush.bf16.msra.mxu3 %v1321_v15  ;;  %v1335_v56 = vld [vmem:[#allocation2 + $0x150] sm:$0xff]  ;;  %v178_v57 = vpack.c.b16 %v171_v54, %v171_v54  ;;  %v1326_v58 = vld [vmem:[#allocation2 + $0x108] sm:$0xff]  ;;  %v1325_v63 = vld [vmem:[#allocation2 + $0x100] sm:$0xff] }
  0x16   :  { %487 = vmatpush.bf16.msra.mxu0 %v1296_v16  ;;  %v1334_v59 = vld [vmem:[#allocation2 + $0x148] sm:$0xff]  ;;  %v57_v60 = vld [vmem:[%s1616_s0 + $0x10] sm:$0xff]  ;;  %v1333_v0 = vld [vmem:[#allocation2 + $0x140] sm:$0xff] }
  0x17   :  { %500 = vmatpush.bf16.msra.mxu1 %v1304_v17  ;;  %v169_v61 = vunpack.c.l.b16 %v57_v60  ;;  %v170_v62 = vunpack.c.h.b16 %v57_v60  ;;  %v1349_v5 = vld [vmem:[%s1619_s3 + $0x38] sm:$0xff]  ;;  %v1348_v6 = vld [vmem:[%s1619_s3 + $0x30] sm:$0xff]  ;;  %v1347_v9 = vld [vmem:[%s1619_s3 + $0x28] sm:$0xff] }
  0x18   :  { %513 = vmatpush.bf16.msra.mxu2 %v1312_v18  ;;  %v1346_v12 = vld [vmem:[%s1619_s3 + $0x20] sm:$0xff]  ;;  %v1345_v14 = vld [vmem:[%s1619_s3 + $0x18] sm:$0xff]  ;;  %v1344_v18 = vld [vmem:[%s1619_s3 + $0x10] sm:$0xff] }
  0x19   :  { %526 = vmatpush.bf16.msra.mxu3 %v1320_v19  ;;  %v176_v1 = vpack.c.b16 %v169_v61, %v169_v61  ;;  %v177_v2 = vpack.c.b16 %v170_v62, %v170_v62  ;;  %v1377_v13 = vld [vmem:[%s1618_s2] ss:$0 sm:$0xff]  ;;  %v1351_v54 = vld [vmem:[%s1621_s5 + $0x8] sm:$0xff] }
  0x1a   :  { %488 = vmatpush.bf16.msra.mxu0 %v1295_v20  ;;  %v1343_v20 = vld [vmem:[%s1619_s3 + $0x8] sm:$0xff]  ;;  %v1354_v51 = vld [vmem:[%s1621_s5 + $0x20] sm:$0xff] }
  0x1b   :  { %501 = vmatpush.bf16.msra.mxu1 %v1303_v21 }
  0x1c   :  { %514 = vmatpush.bf16.msra.mxu2 %v1311_v22 }
  0x1d   :  { %527 = vmatpush.bf16.msra.mxu3 %v1319_v23  ;;  %v1342_v23 = vld [vmem:[%s1619_s3] sm:$0xff] }
  0x1e   :  { %489 = vmatpush.bf16.msra.mxu0 %v1294_v24 }
  0x1f   :  { %502 = vmatpush.bf16.msra.mxu1 %v1302_v25 }
  0x20   :  { %515 = vmatpush.bf16.msra.mxu2 %v1310_v27 }
  0x21   :  { %528 = vmatpush.bf16.msra.mxu3 %v1318_v30 }
  0x22   :  { %490 = vmatpush.bf16.msra.mxu0 %v1293_v32 }
  0x23   :  { %503 = vmatpush.bf16.msra.mxu1 %v1301_v33 }
  0x24   :  { %516 = vmatpush.bf16.msra.mxu2 %v1309_v36 }
  0x25   :  { %491 = vmatmul.bf16.vlgmr.msra.gmra.mxu0 %v172_v38  ;;  %529 = vmatpush.bf16.msra.mxu3 %v1317_v41 }
  0x26   :  { %535 = vmatpush.bf16.msrb.mxu0 %v1332_v34  ;;  %504 = vmatmul.bf16.vlgmr.msra.gmra.mxu1 %v173_v39 }
  0x27   :  { %548 = vmatpush.bf16.msrb.mxu1 %v1340_v35  ;;  %517 = vmatmul.bf16.vlgmr.msra.gmra.mxu2 %v174_v45 }
  0x28   :  { %568 = vmatpush.bf16.msrb.mxu2 %v1341_v42  ;;  %530 = vmatmul.bf16.vlgmr.msra.gmra.mxu3 %v175_v46 }
  0x29   :  { %658 = vmatpush.bf16.msrb.mxu3 %v1349_v5 }
  0x2a   :  { %536 = vmatpush.bf16.msrb.mxu0 %v1331_v43 }
  0x2b   :  { %549 = vmatpush.bf16.msrb.mxu1 %v1339_v44 }
  0x2d   :  { %659 = vmatpush.bf16.msrb.mxu3 %v1348_v6 }
  0x2e   :  { %537 = vmatpush.bf16.msrb.mxu0 %v1330_v47 }
  0x2f   :  { %550 = vmatpush.bf16.msrb.mxu1 %v1338_v48  ;;  %v1357_v48 = vld [vmem:[%s1621_s5 + $0x38] sm:$0xff] }
  0x30   :  { %755 = vmatpush.bf16.msra.mxu2 %v1357_v48 }
  0x31   :  { %660 = vmatpush.bf16.msrb.mxu3 %v1347_v9 }
  0x32   :  { %538 = vmatpush.bf16.msrb.mxu0 %v1329_v49  ;;  %v1356_v49 = vld [vmem:[%s1621_s5 + $0x30] sm:$0xff] }
  0x33   :  { %551 = vmatpush.bf16.msrb.mxu1 %v1337_v50  ;;  %v1355_v50 = vld [vmem:[%s1621_s5 + $0x28] sm:$0xff] }
  0x34   :  { %756 = vmatpush.bf16.msra.mxu2 %v1356_v49 }
  0x35   :  { %661 = vmatpush.bf16.msrb.mxu3 %v1346_v12  ;;  %v1364_v12 = vld [vmem:[%s1623_s7 + $0x30] sm:$0xff] }
  0x36   :  { %539 = vmatpush.bf16.msrb.mxu0 %v1328_v52  ;;  %v1353_v52 = vld [vmem:[%s1621_s5 + $0x18] sm:$0xff] }
  0x37   :  { %552 = vmatpush.bf16.msrb.mxu1 %v1336_v53  ;;  %1164 = vmatmul.msk.bf16.vlgmr.msrb.gmra.mxu2 %vm479_vm0, %v178_v57  ;;  %v1352_v53 = vld [vmem:[%s1621_s5 + $0x10] sm:$0xff] }
  0x38   :  { %757 = vmatpush.bf16.msra.mxu2 %v1355_v50 }
  0x39   :  { %662 = vmatpush.bf16.msrb.mxu3 %v1345_v14  ;;  %v1362_v14 = vld [vmem:[%s1623_s7 + $0x20] sm:$0xff] }
  0x3a   :  { %540 = vmatpush.bf16.msrb.mxu0 %v1327_v55  ;;  %v1350_v55 = vld [vmem:[%s1621_s5] sm:$0xff] }
  0x3b   :  { %553 = vmatpush.bf16.msrb.mxu1 %v1335_v56  ;;  %v1378_v56 = vld [vmem:[%s1620_s4] ss:$0 sm:$0xff] }
  0x3c   :  { %758 = vmatpush.bf16.msra.mxu2 %v1354_v51 }
  0x3d   :  { %663 = vmatpush.bf16.msrb.mxu3 %v1344_v18  ;;  %v1358_v18 = vld [vmem:[%s1623_s7] sm:$0xff] }
  0x3e   :  { %541 = vmatpush.bf16.msrb.mxu0 %v1326_v58 }
  0x3f   :  { %554 = vmatpush.bf16.msrb.mxu1 %v1334_v59 }
  0x40   :  { %759 = vmatpush.bf16.msra.mxu2 %v1353_v52 }
  0x41   :  { %664 = vmatpush.bf16.msrb.mxu3 %v1343_v20 }
  0x42   :  { %542 = vmatpush.bf16.msrb.mxu0 %v1325_v63 }
  0x43   :  { %555 = vmatpush.bf16.msrb.mxu1 %v1333_v0 }
  0x44   :  { %760 = vmatpush.bf16.msra.mxu2 %v1352_v53 }
  0x45   :  { %543 = vmatmul.bf16.vlgmr.msrb.gmra.mxu0 %v176_v1  ;;  %665 = vmatpush.bf16.msrb.mxu3 %v1342_v23 }
  0x46   :  { %556 = vmatmul.bf16.vlgmr.msrb.gmra.mxu1 %v177_v2 }
  0x48   :  { %761 = vmatpush.bf16.msra.mxu2 %v1351_v54 }
  0x4c   :  { %762 = vmatpush.bf16.msra.mxu2 %v1350_v55 }
  0xa2   :  { %v492_v3 = vpop.f32.mrf.mxu0 }
  0xa3   :  { %v505_v4 = vpop.f32.mrf.mxu1  ;;  %v493_v15 = vadd.f32 %v1377_v13, %v492_v3  ;;  %v1363_v13 = vld [vmem:[%s1623_s7 + $0x28] sm:$0xff] }
  0xa5   :  { %v506_v19 = vadd.f32 %v505_v4, %v493_v15  ;;  %v1361_v15 = vld [vmem:[%s1623_s7 + $0x18] sm:$0xff] }
  0xaa   :  { %v494_v7 = vpop.f32.mrf.mxu0  ;;  %v518_v10 = vpop.f32.mrf.mxu2 }
  0xab   :  { %v507_v8 = vpop.f32.mrf.mxu1  ;;  %v531_v11 = vpop.f32.mrf.mxu3  ;;  %v519_v21 = vadd.f32 %v518_v10, %v506_v19  ;;  %v1379_v19 = vld [vmem:[%s1622_s6] ss:$0 sm:$0xff] }
  0xad   :  { %v532_v24 = vadd.f32 %v531_v11, %v519_v21  ;;  %v1365_v11 = vld [vmem:[%s1623_s7 + $0x38] sm:$0xff] }
  0xae   :  { %852 = vmatpush.bf16.msra.mxu0 %v1365_v11 }
  0xb2   :  { %v520_v16 = vpop.f32.mrf.mxu2  ;;  %853 = vmatpush.bf16.msra.mxu0 %v1364_v12 }
  0xb3   :  { %v533_v17 = vpop.f32.mrf.mxu3  ;;  %v1360_v16 = vld [vmem:[%s1623_s7 + $0x10] sm:$0xff] }
  0xb4   :  { %v1359_v17 = vld [vmem:[%s1623_s7 + $0x8] sm:$0xff] }
  0xb6   :  { %854 = vmatpush.bf16.msra.mxu0 %v1363_v13 }
  0xba   :  { %v570_v22 = vpop.f32.mrf.mxu2  ;;  %855 = vmatpush.bf16.msra.mxu0 %v1362_v14 }
  0xbe   :  { %856 = vmatpush.bf16.msra.mxu0 %v1361_v15 }
  0xc2   :  { %v544_v25 = vpop.f32.mrf.mxu0  ;;  %v572_v29 = vpop.f32.mrf.mxu2  ;;  %857 = vmatpush.bf16.msra.mxu0 %v1360_v16 }
  0xc3   :  { %v557_v26 = vpop.f32.mrf.mxu1  ;;  %v545_v27 = vadd.f32 %v544_v25, %v532_v24 }
  0xc5   :  { %v558_v28 = vadd.f32 %v557_v26, %v545_v27 }
  0xc6   :  { %858 = vmatpush.bf16.msra.mxu0 %v1359_v17 }
  0xc7   :  { %v571_v30 = vadd.f32 %v570_v22, %v558_v28 }
  0xc9   :  { %v575_v31 = vand.u32 2147483647, %v571_v30  ;;  %v574_v44 = vmax.f32 %v571_v30, 0.0 }
  0xca   :  { %v546_v32 = vpop.f32.mrf.mxu0  ;;  %859 = vmatpush.bf16.msra.mxu0 %v1358_v18 }
  0xcb   :  { %v559_v33 = vpop.f32.mrf.mxu1  ;;  %v576_v34 = vsub.f32 0.0, %v575_v31 }
  0xcd   :  { %v577_v35 = vmul.f32 1.442695, %v576_v34 }
  0xcf   :  { %1382 = vpow2.f32 %v577_v35 }
  0xd5   :  { %v1383_v36 = vpop.eup %1382 }
  0xd6   :  { %v579_v37 = vadd.f32 1.0, %v1383_v36  ;;  %v582_v38 = vmul.f32 -0.5, %v1383_v36  ;;  %v585_v40 = vand.u32 2147483647, %v1383_v36 }
  0xd8   :  { %1384 = vlog2.f32 %v579_v37  ;;  %v583_v39 = vadd.f32 1.0, %v582_v38  ;;  %vm586_vm1 = vcmp.lt.f32.partialorder %v585_v40, 0.0004427343  ;;  %v1373_v38 = vld [vmem:[%s1625_s9 + $0x38] sm:$0xff]  ;;  %v1371_v40 = vld [vmem:[%s1625_s9 + $0x28] sm:$0xff] }
  0xd9   :  { %949 = vmatpush.bf16.msra.mxu1 %v1373_v38 }
  0xda   :  { %v584_v43 = vmul.f32 %v1383_v36, %v583_v39  ;;  %v1372_v39 = vld [vmem:[%s1625_s9 + $0x30] sm:$0xff] }
  0xdd   :  { %950 = vmatpush.bf16.msra.mxu1 %v1372_v39 }
  0xde   :  { %v1385_v41 = vpop.eup %1384 }
  0xdf   :  { %v581_v42 = vmul.f32 0.6931472, %v1385_v41  ;;  %v1370_v41 = vld [vmem:[%s1625_s9 + $0x20] sm:$0xff] }
  0xe1   :  { %v587_v45 = vsel %vm586_vm1, %v584_v43, %v581_v42  ;;  %951 = vmatpush.bf16.msra.mxu1 %v1371_v40  ;;  %v1369_v42 = vld [vmem:[%s1625_s9 + $0x18] sm:$0xff]  ;;  %v1368_v43 = vld [vmem:[%s1625_s9 + $0x10] sm:$0xff] }
  0xe2   :  { %v588_v46 = vadd.f32 %v587_v45, %v574_v44  ;;  %v1367_v44 = vld [vmem:[%s1625_s9 + $0x8] sm:$0xff]  ;;  %v1366_v45 = vld [vmem:[%s1625_s9] sm:$0xff] }
  0xe4   :  { %v589_v47 = vpack.c.bf16 %v588_v46, %v588_v46  ;;  %v1380_v46 = vld [vmem:[%s1624_s8] ss:$0 sm:$0xff] }
  0xe5   :  { %952 = vmatpush.bf16.msra.mxu1 %v1370_v41 }
  0xe6   :  { %666 = vmatmul.bf16.vlgmr.msrb.gmra.mxu3 %v589_v47 }
  0xe9   :  { %953 = vmatpush.bf16.msra.mxu1 %v1369_v42 }
  0xed   :  { %954 = vmatpush.bf16.msra.mxu1 %v1368_v43 }
  0xf1   :  { %955 = vmatpush.bf16.msra.mxu1 %v1367_v44 }
  0xf5   :  { %956 = vmatpush.bf16.msra.mxu1 %v1366_v45 }
 0x169   :  { %v667_v57 = vpop.f32.mrf.mxu3 }
 0x16a   :  { %v668_v58 = vadd.f32 %v1378_v56, %v667_v57 }
 0x16c   :  { %v672_v59 = vand.u32 2147483647, %v668_v58  ;;  %v671_v7 = vmax.f32 %v668_v58, 0.0 }
 0x16e   :  { %v673_v60 = vsub.f32 0.0, %v672_v59 }
 0x170   :  { %v674_v61 = vmul.f32 1.442695, %v673_v60 }
 0x171   :  { %v669_v62 = vpop.f32.mrf.mxu3 }
 0x172   :  { %1386 = vpow2.f32 %v674_v61 }
 0x178   :  { %v1387_v63 = vpop.eup %1386 }
 0x179   :  { %v676_v0 = vadd.f32 1.0, %v1387_v63  ;;  %v679_v1 = vmul.f32 -0.5, %v1387_v63  ;;  %v682_v3 = vand.u32 2147483647, %v1387_v63 }
 0x17b   :  { %1388 = vlog2.f32 %v676_v0  ;;  %v680_v2 = vadd.f32 1.0, %v679_v1  ;;  %vm683_vm2 = vcmp.lt.f32.partialorder %v682_v3, 0.0004427343  ;;  %v1381_v1 = vld [vmem:[%s1626_s10] ss:$0 sm:$0xff] }
 0x17d   :  { %v681_v6 = vmul.f32 %v1387_v63, %v680_v2 }
 0x181   :  { %v1389_v4 = vpop.eup %1388 }
 0x182   :  { %v678_v5 = vmul.f32 0.6931472, %v1389_v4 }
 0x184   :  { %v684_v8 = vsel %vm683_vm2, %v681_v6, %v678_v5 }
 0x185   :  { %v685_v9 = vadd.f32 %v684_v8, %v671_v7 }
 0x187   :  { %v686_v10 = vpack.c.bf16 %v685_v9, %v685_v9 }
 0x189   :  { %763 = vmatmul.bf16.vlgmr.msra.gmra.mxu2 %v686_v10 }
 0x20c   :  { %v764_v20 = vpop.f32.mrf.mxu2 }
 0x20d   :  { %v765_v21 = vadd.f32 %v1379_v19, %v764_v20 }
 0x20f   :  { %v769_v22 = vand.u32 2147483647, %v765_v21  ;;  %v768_v34 = vmax.f32 %v765_v21, 0.0 }
 0x211   :  { %v770_v23 = vsub.f32 0.0, %v769_v22 }
 0x213   :  { %v771_v24 = vmul.f32 1.442695, %v770_v23 }
 0x214   :  { %v766_v25 = vpop.f32.mrf.mxu2 }
 0x215   :  { %1390 = vpow2.f32 %v771_v24 }
 0x21b   :  { %v1391_v26 = vpop.eup %1390 }
 0x21c   :  { %v773_v27 = vadd.f32 1.0, %v1391_v26  ;;  %v776_v28 = vmul.f32 -0.5, %v1391_v26  ;;  %v779_v30 = vand.u32 2147483647, %v1391_v26 }
 0x21e   :  { %1392 = vlog2.f32 %v773_v27  ;;  %v777_v29 = vadd.f32 1.0, %v776_v28  ;;  %vm780_vm3 = vcmp.lt.f32.partialorder %v779_v30, 0.0004427343 }
 0x220   :  { %v778_v33 = vmul.f32 %v1391_v26, %v777_v29 }
 0x224   :  { %v1393_v31 = vpop.eup %1392 }
 0x225   :  { %v775_v32 = vmul.f32 0.6931472, %v1393_v31 }
 0x227   :  { %v781_v35 = vsel %vm780_vm3, %v778_v33, %v775_v32 }
 0x228   :  { %v782_v36 = vadd.f32 %v781_v35, %v768_v34 }
 0x22a   :  { %v783_v37 = vpack.c.bf16 %v782_v36, %v782_v36 }
 0x22c   :  { %860 = vmatmul.bf16.vlgmr.msra.gmra.mxu0 %v783_v37 }
 0x2a9   :  { %v861_v47 = vpop.f32.mrf.mxu0 }
 0x2aa   :  { %v862_v48 = vadd.f32 %v1380_v46, %v861_v47 }
 0x2ac   :  { %v866_v49 = vand.u32 2147483647, %v862_v48  ;;  %v865_v61 = vmax.f32 %v862_v48, 0.0 }
 0x2ae   :  { %v867_v50 = vsub.f32 0.0, %v866_v49 }
 0x2b0   :  { %v868_v51 = vmul.f32 1.442695, %v867_v50 }
 0x2b1   :  { %v863_v52 = vpop.f32.mrf.mxu0 }
 0x2b2   :  { %1394 = vpow2.f32 %v868_v51 }
 0x2b8   :  { %v1395_v53 = vpop.eup %1394 }
 0x2b9   :  { %v870_v54 = vadd.f32 1.0, %v1395_v53  ;;  %v873_v55 = vmul.f32 -0.5, %v1395_v53  ;;  %v876_v57 = vand.u32 2147483647, %v1395_v53 }
 0x2bb   :  { %1396 = vlog2.f32 %v870_v54  ;;  %v874_v56 = vadd.f32 1.0, %v873_v55  ;;  %vm877_vm4 = vcmp.lt.f32.partialorder %v876_v57, 0.0004427343 }
 0x2bd   :  { %v875_v60 = vmul.f32 %v1395_v53, %v874_v56 }
 0x2c1   :  { %v1397_v58 = vpop.eup %1396 }
 0x2c2   :  { %v872_v59 = vmul.f32 0.6931472, %v1397_v58 }
 0x2c4   :  { %v878_v62 = vsel %vm877_vm4, %v875_v60, %v872_v59 }
 0x2c5   :  { %v879_v63 = vadd.f32 %v878_v62, %v865_v61 }
 0x2c7   :  { %v880_v0 = vpack.c.bf16 %v879_v63, %v879_v63 }
 0x2c9   :  { %957 = vmatmul.bf16.vlgmr.msra.gmra.mxu1 %v880_v0 }
 0x346   :  { %v958_v2 = vpop.f32.mrf.mxu1 }
 0x347   :  { %v959_v3 = vadd.f32 %v1381_v1, %v958_v2 }
 0x349   :  { %962 = vst [vmem:[%s1627_s11] sm:$0xff] %v959_v3 }
 0x34e   :  { %v960_v4 = vpop.f32.mrf.mxu1 }
 0x34f   :  { %967 = vsyncpa [#allocation3], 1 }

</bundles_post_ra>
